<compile_context>
chip_gen: v7x
topology: tpu7x:2x2x1
jax: 0.10.0
libtpu: 0.0.40
codegen_flags: <defaults>
</compile_context>

<pallas_src>
from typing import NamedTuple

import jax
import jax.numpy as jnp
from jax.experimental import pallas as pl
from jax.experimental.pallas import tpu as pltpu

LANE = 128     # TPU lane width: feature dims feeding the MXU / stores are padded to this
SUBLANE = 8    # f32 sublane width: batch tile height is a multiple of this


def _round_up(n, m):
    return ((n + m - 1) // m) * m


def _cdiv(a, b):
    return -(-a // b)


class PreparedDQN(NamedTuple):
    layers: tuple       # 5 x (w_padded, b_padded); w: (in_p, out_p), b: (1, out_p)
    state_dim: int
    action_dim: int


def prepare_params(params):
    """One-time prep: pad feature dims to 128 lanes (zero rows/cols) and cast the
    128-wide hidden/output weights to bf16.  Call once; reuse across forward calls."""
    state_dim = params[0][0].shape[0]
    action_dim = params[-1][0].shape[1]
    layers = []
    for li, (w, b) in enumerate(params):
        b = b.reshape(1, -1)
        in_d, out_d = w.shape
        in_p = in_d if li == 0 else _round_up(in_d, LANE)   # layer-0 K dim = state_dim kept as-is
        out_p = _round_up(out_d, LANE)
        w_p = jnp.zeros((in_p, out_p), jnp.float32).at[:in_d, :out_d].set(w)
        b_p = jnp.zeros((1, out_p), jnp.float32).at[:, :out_d].set(b)
        # fc1 stays f32 (raw-state precision, K is tiny on the MXU); fc2..fc5 bf16.
        w_dtype = jnp.float32 if li == 0 else jnp.bfloat16
        layers.append((w_p.astype(w_dtype), b_p))
    return PreparedDQN(tuple(layers), state_dim, action_dim)


def _default_num_tiles():
    """Two balanced batch tiles on 2-TensorCore chips (v7x), one tile otherwise."""
    try:
        kind = jax.devices()[0].device_kind.lower()
        if "v7" in kind:
            return 2
    except Exception:
        pass
    return 1


def dqn_kernel(x_ref,
               w1_ref, b1_ref, w2_ref, b2_ref, w3_ref, b3_ref,
               w4_ref, b4_ref, w5_ref, b5_ref,
               o_ref):
    """One (TM, .) batch tile of the 5-layer MLP.

    fc1: f32 x f32 (K = state_dim, tiny) -> f32 accumulate.
    fc2..fc5: bf16 x bf16 -> f32 accumulate (MXU-native), f32 bias; ReLU on the VPU.
    Output store is lane-dense (TM, 128).
    """
    # fc1 (f32 input precision)
    h = jnp.dot(x_ref[...], w1_ref[...], preferred_element_type=jnp.float32) + b1_ref[...]
    h = jnp.maximum(h, 0.0).astype(jnp.bfloat16)
    # fc2..fc4
    h = jnp.dot(h, w2_ref[...], preferred_element_type=jnp.float32) + b2_ref[...]
    h = jnp.maximum(h, 0.0).astype(jnp.bfloat16)
    h = jnp.dot(h, w3_ref[...], preferred_element_type=jnp.float32) + b3_ref[...]
    h = jnp.maximum(h, 0.0).astype(jnp.bfloat16)
    h = jnp.dot(h, w4_ref[...], preferred_element_type=jnp.float32) + b4_ref[...]
    h = jnp.maximum(h, 0.0).astype(jnp.bfloat16)
    # fc5: no activation, f32 accumulate + f32 bias
    h = jnp.dot(h, w5_ref[...], preferred_element_type=jnp.float32) + b5_ref[...]
    o_ref[...] = h.astype(o_ref.dtype)


def dqn_forward(x, prepared: PreparedDQN, *, num_tiles=None, max_block_m=4096):
    """x: (B, state_dim) f32.  prepared: output of prepare_params()."""
    batch, state_dim = x.shape
    assert state_dim == prepared.state_dim
    layers = prepared.layers
    out_pad = layers[-1][0].shape[1]

    # ---- batch tiling: balanced tiles sized to the actual batch.
    if num_tiles is None:
        num_tiles = _default_num_tiles()
    num_tiles = max(1, min(num_tiles, _cdiv(batch, SUBLANE)))   # don't split tiny batches
    tm = _round_up(_cdiv(batch, num_tiles), SUBLANE)
    while tm > max_block_m:                                     # VMEM safety for huge batches
        num_tiles *= 2
        tm = _round_up(_cdiv(batch, num_tiles), SUBLANE)
    batch_p = tm * num_tiles

    if batch_p != batch:
        x = jnp.zeros((batch_p, state_dim), x.dtype).at[:batch, :].set(x)

    in_specs = [pl.BlockSpec((tm, state_dim), lambda i: (i, 0))]
    flat_args = [x]
    for w_p, b_p in layers:
        in_specs.append(pl.BlockSpec(w_p.shape, lambda i: (0, 0)))   # resident weights
        in_specs.append(pl.BlockSpec(b_p.shape, lambda i: (0, 0)))   # resident biases
        flat_args.extend([w_p, b_p])

    # Cost hint so XLA overlaps this tiny, overhead-bound kernel with neighbors.
    flops = 0
    bytes_accessed = batch_p * state_dim * 4 + batch_p * out_pad * 4
    for w_p, b_p in layers:
        flops += 2 * batch_p * w_p.shape[0] * w_p.shape[1]
        bytes_accessed += w_p.size * w_p.dtype.itemsize + b_p.size * b_p.dtype.itemsize

    out = pl.pallas_call(
        dqn_kernel,
        out_shape=jax.ShapeDtypeStruct((batch_p, out_pad), jnp.float32),
        grid=(num_tiles,),
        in_specs=in_specs,
        out_specs=pl.BlockSpec((tm, out_pad), lambda i: (i, 0)),
        compiler_params=pltpu.CompilerParams(
            dimension_semantics=("parallel",),   # v7x: shard the balanced tiles across both TCs
        ),
        cost_estimate=pl.CostEstimate(
            flops=int(flops), transcendentals=0, bytes_accessed=int(bytes_accessed)),
    )(*flat_args)

    return out[:batch, :prepared.action_dim]


def init_dqn_params(key, state_dim, action_dim):
    """Deterministic PyTorch-style init: U(-1/sqrt(fan_in), 1/sqrt(fan_in))."""
    dims = [state_dim, 64, 128, 128, 64, action_dim]
    params = []
    for i in range(5):
        fan_in, fan_out = dims[i], dims[i + 1]
        key, kw, kb = jax.random.split(key, 3)
        bound = 1.0 / jnp.sqrt(jnp.float32(fan_in))
        # Stored as (in, out): equivalent to transposing the PyTorch (out, in) weight.
        w = jax.random.uniform(kw, (fan_in, fan_out), jnp.float32, -bound, bound)
        b = jax.random.uniform(kb, (1, fan_out), jnp.float32, -bound, bound)
        params.append((w, b))
    return params


def dqn_reference(x, params):
    h = x
    for i, (w, b) in enumerate(params):
        h = h @ w + b
        if i < len(params) - 1:
            h = jnp.maximum(h, 0.0)
    return h


if __name__ == "__main__":
    state_dim, action_dim = 8, 4
    key = jax.random.PRNGKey(0)
    key, kx, kx2 = jax.random.split(key, 3)
    params = init_dqn_params(key, state_dim, action_dim)
    prepared = prepare_params(params)   # one-time pad + bf16 cast, reused below

    # Small per-step batch (as in the original demo).
    batch = 2
    x = jax.random.normal(kx, (batch, state_dim), jnp.float32)
    out = dqn_forward(x, prepared)
    jax.block_until_ready(out)
    ref = dqn_reference(x, params)
    assert out.shape == (batch, action_dim)
    # bf16 hidden/output matmuls with f32 accumulation: bf16-appropriate tolerance.
    assert jnp.allclose(out, ref, atol=5e-2, rtol=5e-2), "mismatch vs reference (small batch)"

    # Replay-sized batch (exercises balanced tiling / padding and the parallel axis).
    big_batch = 300
    xb = jax.random.normal(kx2, (big_batch, state_dim), jnp.float32)
    out_b = dqn_forward(xb, prepared)
    jax.block_until_ready(out_b)
    ref_b = dqn_reference(xb, params)
    assert out_b.shape == (big_batch, action_dim)
    assert jnp.allclose(out_b, ref_b, atol=5e-2, rtol=5e-2), "mismatch vs reference (large batch)"

    # Explicit 2-tile path (what v7x would pick automatically) also stays correct.
    out_2t = dqn_forward(xb, prepared, num_tiles=2)
    jax.block_until_ready(out_2t)
    assert jnp.allclose(out_2t, ref_b, atol=5e-2, rtol=5e-2), "mismatch vs reference (2 tiles)"

    print("KERNEL_OK")
</pallas_src>

<mosaic_0001>
module attributes {stable_mosaic.version = 11 : i64} {
  func.func @dqn_kernel(%arg0: i32, %arg1: memref<8x8xf32, #tpu.memory_space<vmem>>, %arg2: memref<8x128xf32, #tpu.memory_space<vmem>>, %arg3: memref<1x128xf32, #tpu.memory_space<vmem>>, %arg4: memref<128x128xbf16, #tpu.memory_space<vmem>>, %arg5: memref<1x128xf32, #tpu.memory_space<vmem>>, %arg6: memref<128x128xbf16, #tpu.memory_space<vmem>>, %arg7: memref<1x128xf32, #tpu.memory_space<vmem>>, %arg8: memref<128x128xbf16, #tpu.memory_space<vmem>>, %arg9: memref<1x128xf32, #tpu.memory_space<vmem>>, %arg10: memref<128x128xbf16, #tpu.memory_space<vmem>>, %arg11: memref<1x128xf32, #tpu.memory_space<vmem>>, %arg12: memref<8x128xf32, #tpu.memory_space<vmem>>) attributes {dimension_semantics = [#tpu.dimension_semantics<parallel>], iteration_bounds = array<i64: 1>, scalar_prefetch = 0 : i64, scratch_operands = 0 : i64, tpu.core_type = #tpu.core_type<tc>, window_params = [{transform_indices = @transform_0, window_bounds = array<i64: 8, 8>}, {pipeline_mode = #tpu.pipeline_mode<synchronous>, transform_indices = @transform_1, window_bounds = array<i64: 8, 128>}, {pipeline_mode = #tpu.pipeline_mode<synchronous>, transform_indices = @transform_2, window_bounds = array<i64: 1, 128>}, {pipeline_mode = #tpu.pipeline_mode<synchronous>, transform_indices = @transform_3, window_bounds = array<i64: 128, 128>}, {pipeline_mode = #tpu.pipeline_mode<synchronous>, transform_indices = @transform_4, window_bounds = array<i64: 1, 128>}, {pipeline_mode = #tpu.pipeline_mode<synchronous>, transform_indices = @transform_5, window_bounds = array<i64: 128, 128>}, {pipeline_mode = #tpu.pipeline_mode<synchronous>, transform_indices = @transform_6, window_bounds = array<i64: 1, 128>}, {pipeline_mode = #tpu.pipeline_mode<synchronous>, transform_indices = @transform_7, window_bounds = array<i64: 128, 128>}, {pipeline_mode = #tpu.pipeline_mode<synchronous>, transform_indices = @transform_8, window_bounds = array<i64: 1, 128>}, {pipeline_mode = #tpu.pipeline_mode<synchronous>, transform_indices = @transform_9, window_bounds = array<i64: 128, 128>}, {pipeline_mode = #tpu.pipeline_mode<synchronous>, transform_indices = @transform_10, window_bounds = array<i64: 1, 128>}, {transform_indices = @transform_11, window_bounds = array<i64: 8, 128>}]} {
    %c0 = arith.constant 0 : index
    %c0_0 = arith.constant 0 : index
    %0 = vector.load %arg1[%c0, %c0_0] : memref<8x8xf32, #tpu.memory_space<vmem>>, vector<8x8xf32>
    %c0_1 = arith.constant 0 : index
    %c0_2 = arith.constant 0 : index
    %1 = vector.load %arg2[%c0_1, %c0_2] : memref<8x128xf32, #tpu.memory_space<vmem>>, vector<8x128xf32>
    %cst = arith.constant dense<0.000000e+00> : vector<8x128xf32>
    %2 = tpu.matmul %0, %1, %cst {dimension_numbers = #tpu.dot_dimension_numbers<[1], [0], [0], [1], [0, 0, 1, 1], [], []>} : vector<8x8xf32>, vector<8x128xf32>, vector<8x128xf32> -> vector<8x128xf32>
    %c0_3 = arith.constant 0 : index
    %c0_4 = arith.constant 0 : index
    %3 = vector.load %arg3[%c0_3, %c0_4] : memref<1x128xf32, #tpu.memory_space<vmem>>, vector<1x128xf32>
    %4 = vector.broadcast %3 : vector<1x128xf32> to vector<8x128xf32>
    %5 = arith.addf %2, %4 : vector<8x128xf32>
    %cst_5 = arith.constant 0.000000e+00 : f32
    %6 = vector.broadcast %cst_5 : f32 to vector<8x128xf32>
    %7 = arith.maximumf %5, %6 : vector<8x128xf32>
    %8 = arith.truncf %7 : vector<8x128xf32> to vector<8x128xbf16>
    %c0_6 = arith.constant 0 : index
    %c0_7 = arith.constant 0 : index
    %9 = vector.load %arg4[%c0_6, %c0_7] : memref<128x128xbf16, #tpu.memory_space<vmem>>, vector<128x128xbf16>
    %cst_8 = arith.constant dense<0.000000e+00> : vector<8x128xf32>
    %10 = tpu.matmul %8, %9, %cst_8 {dimension_numbers = #tpu.dot_dimension_numbers<[1], [0], [0], [1], [0, 0, 1, 1], [], []>} : vector<8x128xbf16>, vector<128x128xbf16>, vector<8x128xf32> -> vector<8x128xf32>
    %c0_9 = arith.constant 0 : index
    %c0_10 = arith.constant 0 : index
    %11 = vector.load %arg5[%c0_9, %c0_10] : memref<1x128xf32, #tpu.memory_space<vmem>>, vector<1x128xf32>
    %12 = vector.broadcast %11 : vector<1x128xf32> to vector<8x128xf32>
    %13 = arith.addf %10, %12 : vector<8x128xf32>
    %cst_11 = arith.constant 0.000000e+00 : f32
    %14 = vector.broadcast %cst_11 : f32 to vector<8x128xf32>
    %15 = arith.maximumf %13, %14 : vector<8x128xf32>
    %16 = arith.truncf %15 : vector<8x128xf32> to vector<8x128xbf16>
    %c0_12 = arith.constant 0 : index
    %c0_13 = arith.constant 0 : index
    %17 = vector.load %arg6[%c0_12, %c0_13] : memref<128x128xbf16, #tpu.memory_space<vmem>>, vector<128x128xbf16>
    %cst_14 = arith.constant dense<0.000000e+00> : vector<8x128xf32>
    %18 = tpu.matmul %16, %17, %cst_14 {dimension_numbers = #tpu.dot_dimension_numbers<[1], [0], [0], [1], [0, 0, 1, 1], [], []>} : vector<8x128xbf16>, vector<128x128xbf16>, vector<8x128xf32> -> vector<8x128xf32>
    %c0_15 = arith.constant 0 : index
    %c0_16 = arith.constant 0 : index
    %19 = vector.load %arg7[%c0_15, %c0_16] : memref<1x128xf32, #tpu.memory_space<vmem>>, vector<1x128xf32>
    %20 = vector.broadcast %19 : vector<1x128xf32> to vector<8x128xf32>
    %21 = arith.addf %18, %20 : vector<8x128xf32>
    %cst_17 = arith.constant 0.000000e+00 : f32
    %22 = vector.broadcast %cst_17 : f32 to vector<8x128xf32>
    %23 = arith.maximumf %21, %22 : vector<8x128xf32>
    %24 = arith.truncf %23 : vector<8x128xf32> to vector<8x128xbf16>
    %c0_18 = arith.constant 0 : index
    %c0_19 = arith.constant 0 : index
    %25 = vector.load %arg8[%c0_18, %c0_19] : memref<128x128xbf16, #tpu.memory_space<vmem>>, vector<128x128xbf16>
    %cst_20 = arith.constant dense<0.000000e+00> : vector<8x128xf32>
    %26 = tpu.matmul %24, %25, %cst_20 {dimension_numbers = #tpu.dot_dimension_numbers<[1], [0], [0], [1], [0, 0, 1, 1], [], []>} : vector<8x128xbf16>, vector<128x128xbf16>, vector<8x128xf32> -> vector<8x128xf32>
    %c0_21 = arith.constant 0 : index
    %c0_22 = arith.constant 0 : index
    %27 = vector.load %arg9[%c0_21, %c0_22] : memref<1x128xf32, #tpu.memory_space<vmem>>, vector<1x128xf32>
    %28 = vector.broadcast %27 : vector<1x128xf32> to vector<8x128xf32>
    %29 = arith.addf %26, %28 : vector<8x128xf32>
    %cst_23 = arith.constant 0.000000e+00 : f32
    %30 = vector.broadcast %cst_23 : f32 to vector<8x128xf32>
    %31 = arith.maximumf %29, %30 : vector<8x128xf32>
    %32 = arith.truncf %31 : vector<8x128xf32> to vector<8x128xbf16>
    %c0_24 = arith.constant 0 : index
    %c0_25 = arith.constant 0 : index
    %33 = vector.load %arg10[%c0_24, %c0_25] : memref<128x128xbf16, #tpu.memory_space<vmem>>, vector<128x128xbf16>
    %cst_26 = arith.constant dense<0.000000e+00> : vector<8x128xf32>
    %34 = tpu.matmul %32, %33, %cst_26 {dimension_numbers = #tpu.dot_dimension_numbers<[1], [0], [0], [1], [0, 0, 1, 1], [], []>} : vector<8x128xbf16>, vector<128x128xbf16>, vector<8x128xf32> -> vector<8x128xf32>
    %c0_27 = arith.constant 0 : index
    %c0_28 = arith.constant 0 : index
    %35 = vector.load %arg11[%c0_27, %c0_28] : memref<1x128xf32, #tpu.memory_space<vmem>>, vector<1x128xf32>
    %36 = vector.broadcast %35 : vector<1x128xf32> to vector<8x128xf32>
    %37 = arith.addf %34, %36 : vector<8x128xf32>
    %c0_29 = arith.constant 0 : index
    %c0_30 = arith.constant 0 : index
    %38 = vector.load %arg12[%c0_29, %c0_30] : memref<8x128xf32, #tpu.memory_space<vmem>>, vector<8x128xf32>
    tpu.vector_store %arg12[%c0_29, %c0_30], %37 {strides = array<i32>} : memref<8x128xf32, #tpu.memory_space<vmem>>, vector<8x128xf32>,
    return
  }
  func.func @transform_0(%arg0: i32) -> (i32, i32) {
    %c0_i32 = arith.constant 0 : i32
    %c0_i32_0 = arith.constant 0 : i32
    return %arg0, %c0_i32 : i32, i32
  }
  func.func @transform_1(%arg0: i32) -> (i32, i32) {
    %c0_i32 = arith.constant 0 : i32
    %c0_i32_0 = arith.constant 0 : i32
    %c0_i32_1 = arith.constant 0 : i32
    return %c0_i32, %c0_i32_0 : i32, i32
  }
  func.func @transform_2(%arg0: i32) -> (i32, i32) {
    %c0_i32 = arith.constant 0 : i32
    %c0_i32_0 = arith.constant 0 : i32
    %c0_i32_1 = arith.constant 0 : i32
    return %c0_i32, %c0_i32_0 : i32, i32
  }
  func.func @transform_3(%arg0: i32) -> (i32, i32) {
    %c0_i32 = arith.constant 0 : i32
    %c0_i32_0 = arith.constant 0 : i32
    %c0_i32_1 = arith.constant 0 : i32
    return %c0_i32, %c0_i32_0 : i32, i32
  }
  func.func @transform_4(%arg0: i32) -> (i32, i32) {
    %c0_i32 = arith.constant 0 : i32
    %c0_i32_0 = arith.constant 0 : i32
    %c0_i32_1 = arith.constant 0 : i32
    return %c0_i32, %c0_i32_0 : i32, i32
  }
  func.func @transform_5(%arg0: i32) -> (i32, i32) {
    %c0_i32 = arith.constant 0 : i32
    %c0_i32_0 = arith.constant 0 : i32
    %c0_i32_1 = arith.constant 0 : i32
    return %c0_i32, %c0_i32_0 : i32, i32
  }
  func.func @transform_6(%arg0: i32) -> (i32, i32) {
    %c0_i32 = arith.constant 0 : i32
    %c0_i32_0 = arith.constant 0 : i32
    %c0_i32_1 = arith.constant 0 : i32
    return %c0_i32, %c0_i32_0 : i32, i32
  }
  func.func @transform_7(%arg0: i32) -> (i32, i32) {
    %c0_i32 = arith.constant 0 : i32
    %c0_i32_0 = arith.constant 0 : i32
    %c0_i32_1 = arith.constant 0 : i32
    return %c0_i32, %c0_i32_0 : i32, i32
  }
  func.func @transform_8(%arg0: i32) -> (i32, i32) {
    %c0_i32 = arith.constant 0 : i32
    %c0_i32_0 = arith.constant 0 : i32
    %c0_i32_1 = arith.constant 0 : i32
    return %c0_i32, %c0_i32_0 : i32, i32
  }
  func.func @transform_9(%arg0: i32) -> (i32, i32) {
    %c0_i32 = arith.constant 0 : i32
    %c0_i32_0 = arith.constant 0 : i32
    %c0_i32_1 = arith.constant 0 : i32
    return %c0_i32, %c0_i32_0 : i32, i32
  }
  func.func @transform_10(%arg0: i32) -> (i32, i32) {
    %c0_i32 = arith.constant 0 : i32
    %c0_i32_0 = arith.constant 0 : i32
    %c0_i32_1 = arith.constant 0 : i32
    return %c0_i32, %c0_i32_0 : i32, i32
  }
  func.func @transform_11(%arg0: i32) -> (i32, i32) {
    %c0_i32 = arith.constant 0 : i32
    %c0_i32_0 = arith.constant 0 : i32
    return %arg0, %c0_i32 : i32, i32
  }
}

</mosaic_0001>

<bundles_post_ra>
// kernel: tpu_custom_call.1
= control target key start
LH: loop header
LB: loop body
LE: loop exit
PB: predicated region body
PF: predicated region fallthrough
CT: control target
= control target key end

     0   :  { %16 = vsyncpa [#allocation3], 0  ;;  %s1265_s0 = inlined_call_operand.hbm [shape: f32[8,8], index: 0, kind: input, shape index: {}]   ;;  %s1266_s1 = inlined_call_operand.hbm [shape: f32[8,128], index: 1, kind: input, shape index: {}]   ;;  %s1267_s2 = inlined_call_operand.vmem [shape: f32[1,128], index: 2, kind: input, shape index: {}]   ;;  %s1268_s3 = inlined_call_operand.hbm [shape: bf16[128,128], index: 3, kind: input, shape index: {}]   ;;  %s1269_s4 = inlined_call_operand.vmem [shape: f32[1,128], index: 4, kind: input, shape index: {}]   ;;  %s1270_s5 = inlined_call_operand.hbm [shape: bf16[128,128], index: 5, kind: input, shape index: {}]   ;;  %s1271_s6 = inlined_call_operand.vmem [shape: f32[1,128], index: 6, kind: input, shape index: {}]   ;;  %s1272_s7 = inlined_call_operand.hbm [shape: bf16[128,128], index: 7, kind: input, shape index: {}]   ;;  %s1273_s8 = inlined_call_operand.vmem [shape: f32[1,128], index: 8, kind: input, shape index: {}]   ;;  %s1274_s9 = inlined_call_operand.hbm [shape: bf16[128,128], index: 9, kind: input, shape index: {}]   ;;  %s1275_s10 = inlined_call_operand.vmem [shape: f32[1,128], index: 10, kind: input, shape index: {}]   ;;  %s1276_s11 = inlined_call_operand.hbm [shape: f32[8,128], index: 11, kind: output, shape index: {}]  }
   0x1   :  { %17 = vsyncpa [#allocation6], 0 }
   0x2   :  { %18 = vsyncpa [#allocation9], 0 }
   0x3   :  { %19 = vsyncpa [#allocation12], 0 }
   0x4   :  { %20 = vsyncpa [#allocation4], 0  ;;  %s1040_s17 = smov [#allocation5]   ;;  %s876_s21 = scalar_lea.hbm %s1266_s1, 128 }
   0x5   :  { %s37_s18 = sshll.u32 %s1040_s17, 4  ;;  %p877_p0 = scmp.ne.s32.totalorder %s1266_s1, %s876_s21  ;;  %s38_s18 = int_to_ptr.vmem [resolvable:$true] %s37_s18 }
   0x6   :  { %p880_p1 = scmp.lt.u32.totalorder %s876_s21, %s1266_s1 }
   0x8   :  { %p882_p2 = pnand %p880_p1, %p877_p0 }
   0xa   :  { %885 = shalt.err (!%p882_p2)
}
   0xb   :  { %s886_s26 = scalar_lea.vmem %s38_s18, 128  ;;  %p891_p4 = scmp.lt.s32.totalorder %s38_s18, %s38_s18 }
   0xc   :  { %p887_p3 = scmp.ne.s32.totalorder %s38_s18, %s886_s26  ;;  %p892_p5 = scmp.lt.s32.totalorder %s886_s26, %s886_s26 }
   0xe   :  { %p893_p6 = por %p892_p5, %p891_p4 }
  0x10   :  { %p894_p7 = pnand %p893_p6, %p887_p3 }
  0x12   :  { %897 = shalt.err (!%p894_p7)
}
  0x13   :  { %40 = dma.hbm_to_vmem [thread:$0]  %s1266_s1, 128, %s38_s18, [#allocation6]  }
  0x14   :  { %s1041_s29 = smov [#allocation8]   ;;  %s1042_s12 = smov [#allocation2]  }
  0x15   :  { %s62_s30 = sshll.u32 %s1041_s29, 4  ;;  %s27_s13 = sshll.u32 %s1042_s12, 4  ;;  %s63_s30 = int_to_ptr.vmem [resolvable:$true] %s62_s30  ;;  %s28_s13 = int_to_ptr.vmem [resolvable:$true] %s27_s13 }
  0x16   :  { %s898_s16 = scalar_lea.hbm %s1270_s5, 1024 }
  0x17   :  { %p899_p8 = scmp.ne.s32.totalorder %s1270_s5, %s898_s16  ;;  %p902_p9 = scmp.lt.u32.totalorder %s898_s16, %s1270_s5 }
  0x19   :  { %p904_p10 = pnand %p902_p9, %p899_p8 }
  0x1b   :  { %907 = shalt.err (!%p904_p10)
}
  0x1c   :  { %s908_s1 = scalar_lea.vmem %s63_s30, 1024  ;;  %p913_p12 = scmp.lt.s32.totalorder %s63_s30, %s63_s30 }
  0x1d   :  { %p909_p11 = scmp.ne.s32.totalorder %s63_s30, %s908_s1  ;;  %p914_p13 = scmp.lt.s32.totalorder %s908_s1, %s908_s1 }
  0x1f   :  { %p915_p0 = por %p914_p13, %p913_p12 }
  0x21   :  { %p916_p1 = pnand %p915_p0, %p909_p11 }
  0x23   :  { %919 = shalt.err (!%p916_p1)
}
  0x24   :  { %s1043_s18 = smov 64   ;;  %s1044_s22 = smov 4  }
  0x25   :  { %68 = dma.hbm_to_vmem [thread:$0]  %s1270_s5, 1024, %s63_s30, [#allocation9], %s1043_s18, %s1043_s18, %s1044_s22  }
  0x26   :  { %s920_s27 = scalar_lea.hbm %s1265_s0, 128 }
  0x27   :  { %p921_p2 = scmp.ne.s32.totalorder %s1265_s0, %s920_s27  ;;  %p924_p3 = scmp.lt.u32.totalorder %s920_s27, %s1265_s0 }
  0x29   :  { %p926_p4 = pnand %p924_p3, %p921_p2 }
  0x2b   :  { %929 = shalt.err (!%p926_p4)
}
  0x2c   :  { %s930_s15 = scalar_lea.vmem %s28_s13, 128  ;;  %p935_p6 = scmp.lt.s32.totalorder %s28_s13, %s28_s13 }
  0x2d   :  { %p931_p5 = scmp.ne.s32.totalorder %s28_s13, %s930_s15  ;;  %p936_p7 = scmp.lt.s32.totalorder %s930_s15, %s930_s15 }
  0x2f   :  { %p937_p8 = por %p936_p7, %p935_p6 }
  0x31   :  { %p938_p9 = pnand %p937_p8, %p931_p5 }
  0x33   :  { %941 = shalt.err (!%p938_p9)
}
  0x34   :  { %30 = dma.hbm_to_vmem [thread:$0]  %s1265_s0, 128, %s28_s13, [#allocation3]  }
  0x35   :  { %s1045_s16 = smov [#allocation7]   ;;  %s1046_s19 = smov [#allocation10]  }
  0x36   :  { %s48_s17 = sshll.u32 %s1045_s16, 4  ;;  %s76_s20 = sshll.u32 %s1046_s19, 4  ;;  %s49_s17 = int_to_ptr.vmem [resolvable:$true] %s48_s17  ;;  %s77_s20 = int_to_ptr.vmem [resolvable:$true] %s76_s20 }
  0x37   :  { %s942_s23 = scalar_lea.hbm %s1268_s3, 1024 }
  0x38   :  { %p943_p10 = scmp.ne.s32.totalorder %s1268_s3, %s942_s23  ;;  %p946_p11 = scmp.lt.u32.totalorder %s942_s23, %s1268_s3 }
  0x3a   :  { %p948_p12 = pnand %p946_p11, %p943_p10 }
  0x3c   :  { %951 = shalt.err (!%p948_p12)
}
  0x3d   :  { %s952_s0 = scalar_lea.vmem %s49_s17, 1024  ;;  %p957_p0 = scmp.lt.s32.totalorder %s49_s17, %s49_s17 }
  0x3e   :  { %p953_p13 = scmp.ne.s32.totalorder %s49_s17, %s952_s0  ;;  %p958_p1 = scmp.lt.s32.totalorder %s952_s0, %s952_s0 }
  0x40   :  { %p959_p2 = por %p958_p1, %p957_p0 }
  0x42   :  { %p960_p3 = pnand %p959_p2, %p953_p13 }
  0x44   :  { %963 = shalt.err (!%p960_p3)
}
  0x45   :  { %54 = dma.hbm_to_vmem [thread:$0]  %s1268_s3, 1024, %s49_s17, [#allocation6], %s1043_s18, %s1043_s18, %s1044_s22  }
  0x46   :  { %s964_s14 = scalar_lea.hbm %s1272_s7, 1024 }
  0x47   :  { %p965_p4 = scmp.ne.s32.totalorder %s1272_s7, %s964_s14  ;;  %p968_p5 = scmp.lt.u32.totalorder %s964_s14, %s1272_s7 }
  0x49   :  { %p970_p6 = pnand %p968_p5, %p965_p4 }
  0x4b   :  { %973 = shalt.err (!%p970_p6)
}
  0x4c   :  { %s974_s19 = scalar_lea.vmem %s77_s20, 1024  ;;  %p979_p8 = scmp.lt.s32.totalorder %s77_s20, %s77_s20 }
  0x4d   :  { %p975_p7 = scmp.ne.s32.totalorder %s77_s20, %s974_s19  ;;  %p980_p9 = scmp.lt.s32.totalorder %s974_s19, %s974_s19 }
  0x4f   :  { %p981_p10 = por %p980_p9, %p979_p8 }
  0x51   :  { %p982_p11 = pnand %p981_p10, %p975_p7 }
  0x53   :  { %985 = shalt.err (!%p982_p11)
}
  0x54   :  { %82 = dma.hbm_to_vmem [thread:$0]  %s1272_s7, 1024, %s77_s20, [#allocation9], %s1043_s18, %s1043_s18, %s1044_s22  }
  0x55   :  { %s1047_s21 = smov [#allocation11]   ;;  %s986_s25 = scalar_lea.hbm %s1274_s9, 1024 }
  0x56   :  { %s90_s1 = sshll.u32 %s1047_s21, 4  ;;  %p987_p12 = scmp.ne.s32.totalorder %s1274_s9, %s986_s25  ;;  %s91_s1 = int_to_ptr.vmem [resolvable:$true] %s90_s1 }
  0x57   :  { %p990_p13 = scmp.lt.u32.totalorder %s986_s25, %s1274_s9 }
  0x59   :  { %p992_p0 = pnand %p990_p13, %p987_p12 }
  0x5b   :  { %995 = shalt.err (!%p992_p0)
}
  0x5c   :  { %s996_s28 = scalar_lea.vmem %s91_s1, 1024  ;;  %p1001_p2 = scmp.lt.s32.totalorder %s91_s1, %s91_s1 }
  0x5d   :  { %p997_p1 = scmp.ne.s32.totalorder %s91_s1, %s996_s28  ;;  %p1002_p3 = scmp.lt.s32.totalorder %s996_s28, %s996_s28 }
  0x5f   :  { %p1003_p4 = por %p1002_p3, %p1001_p2 }
  0x61   :  { %p1004_p5 = pnand %p1003_p4, %p997_p1 }
  0x63   :  { %1007 = shalt.err (!%p1004_p5)
}
  0x64   :  { %96 = dma.hbm_to_vmem [thread:$0]  %s1274_s9, 1024, %s91_s1, [#allocation12], %s1043_s18, %s1043_s18, %s1044_s22  }
  0x65   :  { %1030 = dma.done.wait [#allocation3], 128  }
  0x66   :  { %1031 = vsyncadd [#allocation3], 4294967168 }
  0x67   :  { %1032 = dma.done.wait [#allocation6], 1152  }
  0x68   :  { %1033 = vsyncadd [#allocation6], 4294966144 }
  0x69   :  { %1034 = dma.done.wait [#allocation9], 2048  }
  0x6a   :  { %1035 = vsyncadd [#allocation9], 4294965248 }
  0x6b   :  { %1036 = dma.done.wait [#allocation12], 1024  }
  0x6c   :  { %1037 = vsyncadd [#allocation12], 4294966272  ;;  %v1048_v0 = vmov 0.0   ;;  %vm1049_vm0 = vmmov 0   ;;  %vm127_vm1 = vcmask 64512   ;;  %v119_v1 = vld [vmem:[#allocation5] sm:$0xff] }
  0x6d   :  { %748 = vmatprep.subr.mxu0 %v1048_v0  ;;  %750 = vmatprep.mubr.msk.f32.mxu0 %vm1049_vm0, %v1048_v0  ;;  %v118_v2 = vld [vmem:[#allocation2] sm:$0xff]  ;;  %v844_v3 = vld [vmem:[#allocation7] sm:$0xff]   ;;  %v845_v4 = vld [vmem:[#allocation7 + $0x8] sm:$0xff]   ;;  %s1050_s5 = smov [#allocation13]  }
  0x6e   :  { %753 = vmatprep.subr.bf16.mxu1 %v1048_v0  ;;  %769 = vmatprep.mubr.msk.bf16.mxu1 %vm1049_vm0, %v1048_v0  ;;  %v846_v5 = vld [vmem:[#allocation7 + $0x10] sm:$0xff]   ;;  %v847_v6 = vld [vmem:[#allocation7 + $0x18] sm:$0xff]   ;;  %v848_v7 = vld [vmem:[#allocation7 + $0x20] sm:$0xff]   ;;  %s660_s30 = sshll.u32 %s1050_s5, 4  ;;  %s661_s30 = int_to_ptr.vmem [resolvable:$true] %s660_s30 }
  0x6f   :  { %749 = vmatpush3.msra.mxu0 %v119_v1  ;;  %754 = vmatpush3.bf16.msra.mxu1 %v844_v3  ;;  %v849_v8 = vld [vmem:[#allocation7 + $0x28] sm:$0xff]   ;;  %v850_v9 = vld [vmem:[#allocation7 + $0x30] sm:$0xff]   ;;  %v851_v10 = vld [vmem:[#allocation7 + $0x38] sm:$0xff]   ;;  %p1013_p7 = scmp.lt.s32.totalorder %s661_s30, %s661_s30 }
  0x70   :  { %751 = vmatmul.mubr.msk.f32.vlgmr.msra.gmra.mrb[0].mxu0 %vm127_vm1, %v118_v2  ;;  %773 = vmatprep.subr.bf16.mxu0 %v1048_v0  ;;  %v852_v11 = vld [vmem:[#allocation8] sm:$0xff]   ;;  %v853_v12 = vld [vmem:[#allocation8 + $0x8] sm:$0xff]   ;;  %v854_v13 = vld [vmem:[#allocation8 + $0x10] sm:$0xff]  }
  0x71   :  { %789 = vmatprep.mubr.msk.bf16.mxu0 %vm1049_vm0, %v1048_v0  ;;  %755 = vmatprep.subr.bf16.mxu1 %v1048_v0  ;;  %v855_v14 = vld [vmem:[#allocation8 + $0x18] sm:$0xff]   ;;  %v856_v15 = vld [vmem:[#allocation8 + $0x20] sm:$0xff]   ;;  %v857_v16 = vld [vmem:[#allocation8 + $0x28] sm:$0xff]  }
  0x72   :  { %774 = vmatpush3.bf16.msra.mxu0 %v852_v11  ;;  %v672_v17 = vld [vmem:[%s1267_s2] ss:$0 sm:$0xff]  ;;  %v859_v24 = vld [vmem:[#allocation8 + $0x38] sm:$0xff]   ;;  %v860_v25 = vld [vmem:[#allocation10] sm:$0xff]  }
  0x73   :  { %756 = vmatpush3.bf16.msra.mxu1 %v845_v4  ;;  %775 = vmatprep.subr.bf16.mxu0 %v1048_v0  ;;  %v858_v23 = vld [vmem:[#allocation8 + $0x30] sm:$0xff]   ;;  %v861_v26 = vld [vmem:[#allocation10 + $0x8] sm:$0xff]   ;;  %v863_v28 = vld [vmem:[#allocation10 + $0x18] sm:$0xff]  }
  0x74   :  { %757 = vmatprep.subr.bf16.mxu1 %v1048_v0  ;;  %v862_v27 = vld [vmem:[#allocation10 + $0x10] sm:$0xff]   ;;  %v864_v29 = vld [vmem:[#allocation10 + $0x20] sm:$0xff]   ;;  %v865_v30 = vld [vmem:[#allocation10 + $0x28] sm:$0xff]  }
  0x75   :  { %v674_v31 = vld [vmem:[%s1269_s4] ss:$0 sm:$0xff]  ;;  %v867_v40 = vld [vmem:[#allocation10 + $0x38] sm:$0xff]   ;;  %v868_v41 = vld [vmem:[#allocation11] sm:$0xff]  }
  0x76   :  { %776 = vmatpush3.bf16.msra.mxu0 %v853_v12  ;;  %v866_v39 = vld [vmem:[#allocation10 + $0x30] sm:$0xff]   ;;  %v869_v42 = vld [vmem:[#allocation11 + $0x8] sm:$0xff]   ;;  %v871_v44 = vld [vmem:[#allocation11 + $0x18] sm:$0xff]  }
  0x77   :  { %758 = vmatpush3.bf16.msra.mxu1 %v846_v5  ;;  %777 = vmatprep.subr.bf16.mxu0 %v1048_v0  ;;  %v870_v43 = vld [vmem:[#allocation11 + $0x10] sm:$0xff]   ;;  %v872_v45 = vld [vmem:[#allocation11 + $0x20] sm:$0xff]   ;;  %v873_v46 = vld [vmem:[#allocation11 + $0x28] sm:$0xff]  }
  0x78   :  { %759 = vmatprep.subr.bf16.mxu1 %v1048_v0  ;;  %v683_v47 = vld [vmem:[%s1271_s6] ss:$0 sm:$0xff]  ;;  %v875_v56 = vld [vmem:[#allocation11 + $0x38] sm:$0xff]  }
  0x79   :  { %v874_v55 = vld [vmem:[#allocation11 + $0x30] sm:$0xff]  }
  0x7a   :  { %778 = vmatpush3.bf16.msra.mxu0 %v854_v13  ;;  %v692_v57 = vld [vmem:[%s1273_s8] ss:$0 sm:$0xff]  ;;  %s1008_s8 = scalar_lea.vmem %s661_s30, 128 }
  0x7b   :  { %760 = vmatpush3.bf16.msra.mxu1 %v847_v6  ;;  %779 = vmatprep.subr.bf16.mxu0 %v1048_v0  ;;  %v701_v2 = vld [vmem:[%s1275_s10] ss:$0 sm:$0xff]  ;;  %p1009_p6 = scmp.ne.s32.totalorder %s661_s30, %s1008_s8  ;;  %p1014_p8 = scmp.lt.s32.totalorder %s1008_s8, %s1008_s8 }
  0x7c   :  { %761 = vmatprep.subr.bf16.mxu1 %v1048_v0 }
  0x7d   :  { %p1015_p9 = por %p1014_p8, %p1013_p7 }
  0x7e   :  { %780 = vmatpush3.bf16.msra.mxu0 %v855_v14 }
  0x7f   :  { %762 = vmatpush3.bf16.msra.mxu1 %v848_v7  ;;  %781 = vmatprep.subr.bf16.mxu0 %v1048_v0  ;;  %p1016_p10 = pnand %p1015_p9, %p1009_p6 }
  0x80   :  { %763 = vmatprep.subr.bf16.mxu1 %v1048_v0 }
  0x82   :  { %782 = vmatpush3.bf16.msra.mxu0 %v856_v15 }
  0x83   :  { %764 = vmatpush3.bf16.msra.mxu1 %v849_v8  ;;  %783 = vmatprep.subr.bf16.mxu0 %v1048_v0 }
  0x84   :  { %765 = vmatprep.subr.bf16.mxu1 %v1048_v0 }
  0x86   :  { %784 = vmatpush3.bf16.msra.mxu0 %v857_v16 }
  0x87   :  { %766 = vmatpush3.bf16.msra.mxu1 %v850_v9  ;;  %785 = vmatprep.subr.bf16.mxu0 %v1048_v0 }
  0x88   :  { %767 = vmatprep.subr.bf16.mxu1 %v1048_v0 }
  0x8a   :  { %786 = vmatpush3.bf16.msra.mxu0 %v858_v23 }
  0x8b   :  { %768 = vmatpush3.bf16.msra.mxu1 %v851_v10  ;;  %787 = vmatprep.subr.bf16.mxu0 %v1048_v0 }
  0x8c   :  { %793 = vmatprep.subr.bf16.mxu1 %v1048_v0 }
  0x8e   :  { %788 = vmatpush3.bf16.msra.mxu0 %v859_v24 }
  0x8f   :  { %813 = vmatprep.subr.bf16.mxu0 %v1048_v0 }
 0x143   :  { %v197_v18 = vpop.f32.mrb[0].mxu0 }
 0x144   :  { %v198_v19 = vadd.f32 %v672_v17, %v197_v18  ;;  %v752_v20 = vpop.f32.mrb[1].mxu0 }
 0x146   :  { %v201_v21 = vmax.f32 %v198_v19, 0.0 }
 0x148   :  { %v202_v22 = vpack.c.bf16 %v201_v21, %v201_v21 }
 0x14a   :  { %770 = vmatmul.mubr.bf16.vlgmr.msra.gmra.mrb[0].mxu1 %v202_v22 }
 0x14b   :  { %809 = vmatprep.mubr.msk.bf16.mxu1 %vm1049_vm0, %v1048_v0  ;;  %794 = vmatpush3.bf16.msra.mxu1 %v860_v25 }
 0x14c   :  { %795 = vmatprep.subr.bf16.mxu1 %v1048_v0 }
 0x14f   :  { %796 = vmatpush3.bf16.msra.mxu1 %v861_v26 }
 0x150   :  { %797 = vmatprep.subr.bf16.mxu1 %v1048_v0 }
 0x153   :  { %798 = vmatpush3.bf16.msra.mxu1 %v862_v27 }
 0x154   :  { %799 = vmatprep.subr.bf16.mxu1 %v1048_v0 }
 0x157   :  { %800 = vmatpush3.bf16.msra.mxu1 %v863_v28 }
 0x158   :  { %801 = vmatprep.subr.bf16.mxu1 %v1048_v0 }
 0x15b   :  { %802 = vmatpush3.bf16.msra.mxu1 %v864_v29 }
 0x15c   :  { %803 = vmatprep.subr.bf16.mxu1 %v1048_v0 }
 0x15f   :  { %804 = vmatpush3.bf16.msra.mxu1 %v865_v30 }
 0x160   :  { %805 = vmatprep.subr.bf16.mxu1 %v1048_v0 }
 0x163   :  { %806 = vmatpush3.bf16.msra.mxu1 %v866_v39 }
 0x164   :  { %807 = vmatprep.subr.bf16.mxu1 %v1048_v0 }
 0x167   :  { %808 = vmatpush3.bf16.msra.mxu1 %v867_v40 }
 0x21d   :  { %v308_v32 = vpop.f32.mrb[0].mxu1 }
 0x21e   :  { %v309_v33 = vadd.f32 %v674_v31, %v308_v32  ;;  %v771_v34 = vpop.f32.mrb[1].mxu1 }
 0x21f   :  { %v311_v35 = vpop.f32.mrb[2].mxu1 }
 0x220   :  { %v314_v36 = vmax.f32 %v309_v33, 0.0  ;;  %v772_v37 = vpop.f32.mrb[3].mxu1 }
 0x222   :  { %v315_v38 = vpack.c.bf16 %v314_v36, %v314_v36 }
 0x224   :  { %790 = vmatmul.mubr.bf16.vlgmr.msra.gmra.mrb[4].mxu0 %v315_v38 }
 0x225   :  { %829 = vmatprep.mubr.msk.bf16.mxu0 %vm1049_vm0, %v1048_v0  ;;  %814 = vmatpush3.bf16.msra.mxu0 %v868_v41 }
 0x226   :  { %815 = vmatprep.subr.bf16.mxu0 %v1048_v0 }
 0x229   :  { %816 = vmatpush3.bf16.msra.mxu0 %v869_v42 }
 0x22a   :  { %817 = vmatprep.subr.bf16.mxu0 %v1048_v0 }
 0x22d   :  { %818 = vmatpush3.bf16.msra.mxu0 %v870_v43 }
 0x22e   :  { %819 = vmatprep.subr.bf16.mxu0 %v1048_v0 }
 0x231   :  { %820 = vmatpush3.bf16.msra.mxu0 %v871_v44 }
 0x232   :  { %821 = vmatprep.subr.bf16.mxu0 %v1048_v0 }
 0x235   :  { %822 = vmatpush3.bf16.msra.mxu0 %v872_v45 }
 0x236   :  { %823 = vmatprep.subr.bf16.mxu0 %v1048_v0 }
 0x239   :  { %824 = vmatpush3.bf16.msra.mxu0 %v873_v46 }
 0x23a   :  { %825 = vmatprep.subr.bf16.mxu0 %v1048_v0 }
 0x23d   :  { %826 = vmatpush3.bf16.msra.mxu0 %v874_v55 }
 0x23e   :  { %827 = vmatprep.subr.bf16.mxu0 %v1048_v0 }
 0x241   :  { %828 = vmatpush3.bf16.msra.mxu0 %v875_v56 }
 0x2f7   :  { %v421_v48 = vpop.f32.mrb[4].mxu0 }
 0x2f8   :  { %v422_v49 = vadd.f32 %v683_v47, %v421_v48  ;;  %v791_v50 = vpop.f32.mrb[5].mxu0 }
 0x2f9   :  { %v424_v51 = vpop.f32.mrb[6].mxu0 }
 0x2fa   :  { %v427_v52 = vmax.f32 %v422_v49, 0.0  ;;  %v792_v53 = vpop.f32.mrb[7].mxu0 }
 0x2fc   :  { %v428_v54 = vpack.c.bf16 %v427_v52, %v427_v52 }
 0x2fe   :  { %810 = vmatmul.mubr.bf16.vlgmr.msra.gmra.mrb[4].mxu1 %v428_v54 }
 0x3d1   :  { %v534_v58 = vpop.f32.mrb[4].mxu1 }
 0x3d2   :  { %v535_v59 = vadd.f32 %v692_v57, %v534_v58  ;;  %v811_v60 = vpop.f32.mrb[5].mxu1 }
 0x3d3   :  { %v537_v61 = vpop.f32.mrb[6].mxu1 }
 0x3d4   :  { %v540_v62 = vmax.f32 %v535_v59, 0.0  ;;  %v812_v63 = vpop.f32.mrb[7].mxu1 }
 0x3d6   :  { %v541_v1 = vpack.c.bf16 %v540_v62, %v540_v62 }
 0x3d8   :  { %830 = vmatmul.mubr.bf16.vlgmr.msra.gmra.mrb[8].mxu0 %v541_v1 }
 0x4ab   :  { %v647_v0 = vpop.f32.mrb[8].mxu0 }
 0x4ac   :  { %v648_v3 = vadd.f32 %v701_v2, %v647_v0  ;;  %v831_v4 = vpop.f32.mrb[9].mxu0 }
 0x4ad   :  { %v650_v5 = vpop.f32.mrb[10].mxu0 }
 0x4ae   :  { %653 = vst [vmem:[#allocation13] sm:$0xff] %v648_v3  ;;  %v832_v6 = vpop.f32.mrb[11].mxu0 }
 0x4af   :  { %1019 = shalt.err (!%p1016_p10)
}
 0x4b0   :  { %s1020_s10 = scalar_lea.hbm %s1276_s11, 128 }
 0x4b1   :  { %p1021_p11 = scmp.ne.s32.totalorder %s1276_s11, %s1020_s10  ;;  %p1024_p12 = scmp.lt.u32.totalorder %s1020_s10, %s1276_s11 }
 0x4b3   :  { %p1026_p13 = pnand %p1024_p12, %p1021_p11 }
 0x4b5   :  { %1029 = shalt.err (!%p1026_p13)
}
 0x4b6   :  { %663 = dma.vmem_to_hbm [thread:$0]  %s661_s30, 128, %s1276_s11, [#allocation4]  }
 0x4b7   :  { %1038 = dma.done.wait [#allocation4], 128  }
 0x4b8   :  { %1039 = vsyncadd [#allocation4], 4294967168 }
 0x4b9   :  { %667 = vsyncpa [#allocation3], 1 }
 0x4ba   :  { %668 = vsyncpa [#allocation6], 1 }
 0x4bb   :  { %669 = vsyncpa [#allocation9], 1 }
 0x4bc   :  { %670 = vsyncpa [#allocation12], 1 }
 0x4bd   :  { %671 = vsyncpa [#allocation4], 1 }

</bundles_post_ra>
